<compile_context>
chip_gen: v5e
topology: v5e:2x2
jax: 0.10.0
libtpu: 0.0.40
codegen_flags: <defaults>
</compile_context>

<pallas_src>
import functools

import numpy as np
import jax
import jax.numpy as jnp
from jax.experimental import pallas as pl
from jax.experimental.pallas import tpu as pltpu

_MIB = 1024 * 1024


def _selection_matrix(out_size, in_size, pad_before, dtype):
    """0/1 matrix (out_size, in_size): row i selects the source pixel of
    output position i after 2x nearest upsample + reflection padding."""
    up = 2 * in_size
    idx = np.arange(out_size) - pad_before
    idx = np.where(idx < 0, -idx, idx)                    # reflect (no edge repeat)
    idx = np.where(idx >= up, 2 * (up - 1) - idx, idx)
    src = idx // 2                                        # nearest-neighbor 2x upsample
    assert (src >= 0).all() and (src < in_size).all(), \
        "reflection pad wider than upsampled extent is unsupported"
    m = np.zeros((out_size, in_size), dtype)
    m[np.arange(out_size), src] = 1.0
    return m


def _tpu_budget():
    """(physical VMEM bytes, TensorCores per chip) with safe fallbacks."""
    kind = ""
    try:
        kind = jax.devices()[0].device_kind.lower()
    except Exception:
        pass
    vmem = None
    try:
        vmem = int(pltpu.get_tpu_info().vmem_capacity_bytes)
    except Exception:
        vmem = None
    if not vmem:
        vmem = 64 * _MIB if "7" in kind else 128 * _MIB   # v7x: 64 MiB per core
    num_cores = 2 if ("7" in kind or vmem <= 64 * _MIB) else 1
    return vmem, num_cores


def _divisors(n):
    out = set()
    i = 1
    while i * i <= n:
        if n % i == 0:
            out.add(i)
            out.add(n // i)
        i += 1
    return out


def _pick_rows(nc, cap_rows, sub, num_cores):
    """Rows per grid step: full extent or a multiple of the sublane tile,
    <= cap_rows, preferring a divisor of nc (no ragged tail, no array padding).
    The grid is only split when a second TensorCore (v7x) can use it."""
    if nc <= sub:
        return nc                               # full-extent block: layout-legal
    max_b = min(max(1, cap_rows), nc)
    max_b = max(sub, (max_b // sub) * sub)
    if num_cores >= 2 and nc >= 2 * sub:        # keep both v7x cores busy
        max_b = min(max_b, max(sub, ((nc // 2) // sub) * sub))
    for d in sorted(_divisors(nc), reverse=True):
        if d <= max_b and d % sub == 0:
            return d
    return max_b                                # ragged tail: Pallas clips stores


def _kron_kernel(prec, st_ref, x_ref, o_ref):
    # st: (h2*w2, out_h*out_w), x: (rows, h2*w2) -> o: (rows, out_h*out_w).
    o_ref[...] = jnp.dot(
        x_ref[...], st_ref[...],
        preferred_element_type=jnp.float32, precision=prec,
    ).astype(o_ref.dtype)


def _factored_kernel(prec, rh_ref, rwt_ref, x_ref, o_ref):
    # Fallback for planes too large for the kron selection matrix.
    # rh: (out_h, h2), rwt: (w2, out_w), x: (rows, h2, w2) -> o: (rows, out_h, out_w).
    # One big channel-batched block per grid step (MB-scale DMAs); the
    # per-plane 2-D matmuls run in an in-kernel loop.
    rh = rh_ref[...]
    rwt = rwt_ref[...]

    @pl.loop(0, x_ref.shape[0])
    def _(j):
        t = jnp.dot(rh, x_ref[j], preferred_element_type=jnp.float32,
                    precision=prec).astype(x_ref.dtype)   # exact: 0/1 selection
        o_ref[j] = jnp.dot(t, rwt, preferred_element_type=jnp.float32,
                           precision=prec).astype(o_ref.dtype)


def upsample_reshape_eval(x1, x2):
    n, c, h1, w1 = x1.shape
    n2, c2, h2, w2 = x2.shape
    assert (n, c) == (n2, c2)

    # Reproduce the PyTorch padding arithmetic exactly: the `% 2 is 0.0` test
    # is always False, so left = int(diff/2), right = diff - left (same top/bot).
    left = right = top = bot = 0
    if w1 != 2 * w2:
        lef_right = w1 - 2 * w2
        left = int(lef_right / 2)
        right = int(lef_right - left)
    if h1 != 2 * h2:
        top_bot = h1 - 2 * h2
        top = int(top_bot / 2)
        bot = int(top_bot - top)
    out_h = 2 * h2 + top + bot      # == h1
    out_w = 2 * w2 + left + right   # == w1

    # Selection dtype / precision: bf16 0/1 selection with f32 accumulation is
    # exact single-pass; f32 uses HIGHEST so the "copy" stays bit-exact.
    if np.dtype(x2.dtype) == np.float32:
        sel_dtype = np.float32
        prec = jax.lax.Precision.HIGHEST
        mxu_passes = 3
    else:
        sel_dtype = np.dtype(x2.dtype)
        prec = jax.lax.Precision.DEFAULT
        mxu_passes = 1

    rh = _selection_matrix(out_h, h2, top, sel_dtype)     # (out_h, h2)
    rw = _selection_matrix(out_w, w2, left, sel_dtype)    # (out_w, w2)

    nc = n * c
    in_hw = h2 * w2
    out_hw = out_h * out_w
    itemsize = np.dtype(x2.dtype).itemsize
    sel_itemsize = np.dtype(sel_dtype).itemsize
    sub = {1: 32, 2: 16, 4: 8}.get(itemsize, 8)           # sublane tile (rows)
    plane_bytes = (in_hw + out_hw) * itemsize

    vmem_cap, num_cores = _tpu_budget()
    # Generation-aware working-set budget: ~40 MiB on v7x (64 MiB physical),
    # 64 MiB on v5e/v6e (128 MiB physical).  The kron selection matrix gets a
    # quarter of it; it is counted double-buffered even though its index_map is
    # constant (conservative so the v7x budget can never be blown).
    total_budget = min(64 * _MIB, (vmem_cap * 5) // 8)
    kron_limit = total_budget // 4

    kron_bytes = in_hw * out_hw * sel_itemsize
    # Roofline: kron does ~2*in_hw (x MXU passes) flops per output element vs
    # ~2*(h2+w2) for the factored form; past this the kron path turns MXU-bound
    # (earliest for f32/HIGHEST and on v5e/v7x), so switch to the factored form.
    flop_threshold = 128 if mxu_passes > 1 else 512
    use_kron = (kron_bytes <= kron_limit
                and in_hw <= flop_threshold
                and 2 * kron_bytes + 2 * sub * plane_bytes <= total_budget)

    if use_kron:
        # Lane-dense single-matmul path over flattened spatial.
        st = jnp.asarray(
            np.kron(rh.astype(np.float32), rw.astype(np.float32))
            .T.astype(sel_dtype))                         # (in_hw, out_hw)
        x2_flat = x2.reshape(nc, in_hw)                   # free metadata reshape

        block_budget = max(total_budget - 2 * kron_bytes, 2 * sub * plane_bytes)
        rows = _pick_rows(nc, block_budget // (2 * plane_bytes), sub, num_cores)
        grid_len = pl.cdiv(nc, rows)

        vmem_need = 2 * kron_bytes + 2 * rows * plane_bytes
        vmem_limit = int(min(max(vmem_need + 4 * _MIB, 16 * _MIB), vmem_cap))

        cost = pl.CostEstimate(
            flops=int(2 * nc * in_hw * out_hw * mxu_passes),
            transcendentals=0,
            bytes_accessed=int(nc * plane_bytes + kron_bytes))

        out_flat = pl.pallas_call(
            functools.partial(_kron_kernel, prec),
            out_shape=jax.ShapeDtypeStruct((nc, out_hw), x2.dtype),
            grid_spec=pltpu.PrefetchScalarGridSpec(
                num_scalar_prefetch=0,
                grid=(grid_len,),
                in_specs=[
                    pl.BlockSpec((in_hw, out_hw), lambda i: (0, 0)),
                    pl.BlockSpec((rows, in_hw), lambda i: (i, 0)),
                ],
                out_specs=pl.BlockSpec((rows, out_hw), lambda i: (i, 0)),
            ),
            compiler_params=pltpu.CompilerParams(
                dimension_semantics=("parallel",),
                vmem_limit_bytes=vmem_limit),
            cost_estimate=cost,
        )(st, x2_flat)
        return out_flat.reshape(n, c, out_h, out_w)       # free metadata reshape

    # Fallback: channel-batched factored form (rh @ plane @ rw.T).
    rh_j = jnp.asarray(rh)                                # (out_h, h2)
    rwt_j = jnp.asarray(np.ascontiguousarray(rw.T))       # (w2, out_w)
    x2_planes = x2.reshape(nc, h2, w2)

    per_row = 2 * plane_bytes                             # dbl-buffered in+out rows
    fixed = (2 * (out_h * h2 + w2 * out_w) * sel_itemsize
             + 4 * (out_h * w2 + out_hw))                 # f32 temporaries
    block_budget = max(total_budget - fixed, per_row)
    rows = _pick_rows(nc, block_budget // per_row, 1, num_cores)
    grid_len = pl.cdiv(nc, rows)

    vmem_need = fixed + rows * per_row
    vmem_limit = int(min(max(vmem_need + 4 * _MIB, 16 * _MIB), vmem_cap))

    cost = pl.CostEstimate(
        flops=int(2 * nc * (out_h * h2 * w2 + out_h * w2 * out_w) * mxu_passes),
        transcendentals=0,
        bytes_accessed=int(nc * plane_bytes
                           + (out_h * h2 + w2 * out_w) * sel_itemsize))

    # NOTE: on this rare large-plane path the stores are (out_h, out_w) blocks;
    # they are lane-dense when out_w % 128 == 0 (typical at these sizes), and a
    # fully flattened output would require an in-kernel relayout costing more
    # than the masked stores it removes.
    out_planes = pl.pallas_call(
        functools.partial(_factored_kernel, prec),
        out_shape=jax.ShapeDtypeStruct((nc, out_h, out_w), x2.dtype),
        grid_spec=pltpu.PrefetchScalarGridSpec(
            num_scalar_prefetch=0,
            grid=(grid_len,),
            in_specs=[
                pl.BlockSpec((out_h, h2), lambda i: (0, 0)),
                pl.BlockSpec((w2, out_w), lambda i: (0, 0)),
                pl.BlockSpec((rows, h2, w2), lambda i: (i, 0, 0)),
            ],
            out_specs=pl.BlockSpec((rows, out_h, out_w), lambda i: (i, 0, 0)),
        ),
        compiler_params=pltpu.CompilerParams(
            dimension_semantics=("parallel",),
            vmem_limit_bytes=vmem_limit),
        cost_estimate=cost,
    )(rh_j, rwt_j, x2_planes)
    return out_planes.reshape(n, c, out_h, out_w)


if __name__ == "__main__":
    key = jax.random.PRNGKey(0)
    k1, k2 = jax.random.split(key)
    # x1 provides the target spatial size; x2 is the tensor to upsample+pad.
    x1 = jax.random.normal(k1, (2, 4, 16, 16), dtype=jnp.float32)
    x2 = jax.random.normal(k2, (2, 4, 7, 7), dtype=jnp.float32)

    out = upsample_reshape_eval(x1, x2)
    jax.block_until_ready(out)

    # Pure-numpy reference: nearest 2x upsample then reflection pad (1,1,1,1).
    x2n = np.asarray(x2)
    up = np.repeat(np.repeat(x2n, 2, axis=2), 2, axis=3)
    ref = np.pad(up, ((0, 0), (0, 0), (1, 1), (1, 1)), mode="reflect")
    assert out.shape == ref.shape == x1.shape
    np.testing.assert_allclose(np.asarray(out), ref, rtol=1e-6, atol=1e-6)

    print("KERNEL_OK")
</pallas_src>

<mosaic_0001>
module attributes {stable_mosaic.version = 11 : i64} {
  func.func @_kron_kernel(%arg0: i32, %arg1: memref<49x256xf32, #tpu.memory_space<vmem>>, %arg2: memref<8x49xf32, #tpu.memory_space<vmem>>, %arg3: memref<8x256xf32, #tpu.memory_space<vmem>>) attributes {dimension_semantics = [#tpu.dimension_semantics<parallel>], iteration_bounds = array<i64: 1>, scalar_prefetch = 0 : i64, scratch_operands = 0 : i64, tpu.core_type = #tpu.core_type<tc>, window_params = [{pipeline_mode = #tpu.pipeline_mode<synchronous>, transform_indices = @transform_0, window_bounds = array<i64: 49, 256>}, {transform_indices = @transform_1, window_bounds = array<i64: 8, 49>}, {transform_indices = @transform_2, window_bounds = array<i64: 8, 256>}]} {
    %c0 = arith.constant 0 : index
    %c0_0 = arith.constant 0 : index
    %0 = vector.load %arg2[%c0, %c0_0] : memref<8x49xf32, #tpu.memory_space<vmem>>, vector<8x49xf32>
    %c0_1 = arith.constant 0 : index
    %c0_2 = arith.constant 0 : index
    %1 = vector.load %arg1[%c0_1, %c0_2] : memref<49x256xf32, #tpu.memory_space<vmem>>, vector<49x256xf32>
    %cst = arith.constant dense<0.000000e+00> : vector<8x256xf32>
    %2 = tpu.matmul %0, %1, %cst {dimension_numbers = #tpu.dot_dimension_numbers<[1], [0], [0], [1], [0, 0, 1, 1], [], []>, precision = #tpu.contract_precision<fp32>} : vector<8x49xf32>, vector<49x256xf32>, vector<8x256xf32> -> vector<8x256xf32>
    %c0_3 = arith.constant 0 : index
    %c0_4 = arith.constant 0 : index
    %3 = vector.load %arg3[%c0_3, %c0_4] : memref<8x256xf32, #tpu.memory_space<vmem>>, vector<8x256xf32>
    tpu.vector_store %arg3[%c0_3, %c0_4], %2 {strides = array<i32>} : memref<8x256xf32, #tpu.memory_space<vmem>>, vector<8x256xf32>,
    return
  }
  func.func @transform_0(%arg0: i32) -> (i32, i32) {
    %c0_i32 = arith.constant 0 : i32
    %c0_i32_0 = arith.constant 0 : i32
    %c0_i32_1 = arith.constant 0 : i32
    return %c0_i32, %c0_i32_0 : i32, i32
  }
  func.func @transform_1(%arg0: i32) -> (i32, i32) {
    %c0_i32 = arith.constant 0 : i32
    %c0_i32_0 = arith.constant 0 : i32
    return %arg0, %c0_i32 : i32, i32
  }
  func.func @transform_2(%arg0: i32) -> (i32, i32) {
    %c0_i32 = arith.constant 0 : i32
    %c0_i32_0 = arith.constant 0 : i32
    return %arg0, %c0_i32 : i32, i32
  }
}

</mosaic_0001>

<bundles_post_ra>
// kernel: tpu_custom_call.1
= control target key start
LH: loop header
LB: loop body
LE: loop exit
PB: predicated region body
PF: predicated region fallthrough
CT: control target
= control target key end

     0   :  { %7 = vsyncpa [#allocation3], 0  ;;  %s869_s0 = inlined_call_operand.hbm [shape: f32[49,256], index: 0, kind: input, shape index: {}]   ;;  %s870_s1 = inlined_call_operand.hbm [shape: f32[8,49], index: 1, kind: input, shape index: {}]   ;;  %s871_s2 = inlined_call_operand.hbm [shape: f32[8,256], index: 2, kind: output, shape index: {}]  }
   0x1   :  { %8 = vsyncpa [#allocation6], 0 }
   0x2   :  { %9 = vsyncpa [#allocation4], 0  ;;  %s14_s11 = sshll.u32 %s869_s0, 4  ;;  %s619_s12 = smov [#allocation2]   ;;  %s15_s11 = int_to_ptr.hbm [resolvable:$true] %s14_s11 }
   0x3   :  { %s16_s13 = sshll.u32 %s619_s12, 4  ;;  %s28_s16 = sshll.u32 %s870_s1, 4  ;;  %s17_s13 = int_to_ptr.vmem [resolvable:$true] %s16_s13  ;;  %s29_s16 = int_to_ptr.hbm [resolvable:$true] %s28_s16 }
   0x4   :  { %s620_s17 = smov 256   ;;  %s621_s18 = smov 16  }
   0x5   :  { %22 = dma.hbm_to_vmem [thread:$0]  %s15_s11, 1792, %s17_s13, [#allocation3], %s620_s17, %s620_s17, %s621_s18  }
   0x6   :  { %s622_s19 = smov [#allocation5]  }
   0x7   :  { %s30_s20 = sshll.u32 %s622_s19, 4  ;;  %s31_s20 = int_to_ptr.vmem [resolvable:$true] %s30_s20 }
   0x8   :  { %33 = dma.hbm_to_vmem [thread:$0]  %s29_s16, 128, %s31_s20, [#allocation6]  }
   0x9   :  { %613 = dma.done.wait [#allocation3], 1792  }
   0xa   :  { %614 = vsyncadd [#allocation3], 4294965504 }
   0xb   :  { %615 = dma.done.wait [#allocation6], 128  }
   0xc   :  { %616 = vsyncadd [#allocation6], 4294967168  ;;  %vm61_vm0 = vcmask 1040384   ;;  %v55_v0 = vld [vmem:[#allocation2 + $0x60] sm:$0x1]  ;;  %v53_v1 = vld [vmem:[#allocation2 + $0x50] sm:$0xff] }
   0xd   :  { %v51_v2 = vld [vmem:[#allocation2 + $0x40] sm:$0xff]  ;;  %v63_v3 = vsel %vm61_vm0, %v55_v0, 0  ;;  %v646_v4 = vand.u32 4294901760, %v53_v1  ;;  %v49_v6 = vld [vmem:[#allocation2 + $0x30] sm:$0xff]  ;;  %v56_v17 = vld [vmem:[#allocation2 + $0x68] sm:$0x1] }
   0xe   :  { %v648_v5 = vand.u32 4294901760, %v51_v2  ;;  %v47_v7 = vld [vmem:[#allocation2 + $0x20] sm:$0xff]  ;;  %v45_v8 = vld [vmem:[#allocation2 + $0x10] sm:$0xff]  ;;  %v650_v9 = vand.u32 4294901760, %v63_v3  ;;  %v652_v10 = vand.u32 4294901760, %v49_v6  ;;  %v66_v21 = vsel %vm61_vm0, %v56_v17, 0 }
   0xf   :  { %v654_v11 = vand.u32 4294901760, %v47_v7  ;;  %v656_v12 = vand.u32 4294901760, %v45_v8  ;;  %v43_v13 = vld [vmem:[#allocation2] sm:$0xff]  ;;  %v659_v14 = vsub.f32 %v53_v1, %v646_v4  ;;  %v54_v22 = vld [vmem:[#allocation2 + $0x58] sm:$0xff]  ;;  %v52_v27 = vld [vmem:[#allocation2 + $0x48] sm:$0xff]  ;;  %v691_v31 = vand.u32 4294901760, %v66_v21 }
  0x10   :  { %v662_v15 = vsub.f32 %v51_v2, %v648_v5  ;;  %v664_v16 = vand.u32 4294901760, %v43_v13  ;;  %78 = vmatpush.msra.mxu0 %v650_v9  ;;  %v668_v18 = vsub.f32 %v63_v3, %v650_v9  ;;  %202 = vmatpush.msra.mxu3 %v650_v9  ;;  %v672_v19 = vsub.f32 %v49_v6, %v652_v10  ;;  %v50_v38 = vld [vmem:[#allocation2 + $0x38] sm:$0xff]  ;;  %v42_v41 = vld [vmem:[#allocation5] sm:$0xff]  ;;  %v48_v42 = vld [vmem:[#allocation2 + $0x28] sm:$0xff]  ;;  %s623_s0 = smov [#allocation7]   ;;  %s525_s23 = sshll.u32 %s871_s2, 4  ;;  %s526_s23 = int_to_ptr.hbm [resolvable:$true] %s525_s23 }
  0x11   :  { %v675_v20 = vsub.f32 %v47_v7, %v654_v11  ;;  %v117_v23 = vand.u32 4294901760, %v659_v14  ;;  %v681_v25 = vsub.f32 %v45_v8, %v656_v12  ;;  %v700_v34 = vand.u32 4294901760, %v54_v22  ;;  %v46_v51 = vld [vmem:[#allocation2 + $0x18] sm:$0xff]  ;;  %v44_v60 = vld [vmem:[#allocation2 + $0x8] sm:$0xff]  ;;  %s523_s1 = sshll.u32 %s623_s0, 4  ;;  %s524_s1 = int_to_ptr.vmem [resolvable:$true] %s523_s1 }
  0x12   :  { %v123_v24 = vand.u32 4294901760, %v662_v15  ;;  %v684_v26 = vsub.f32 %v43_v13, %v664_v16  ;;  %167 = vmatpush.msra.mxu2 %v668_v18  ;;  %80 = vmatpush.msra.mxu0 %v646_v4  ;;  %v111_v28 = vand.u32 4294901760, %v668_v18  ;;  %v129_v29 = vand.u32 4294901760, %v672_v19 }
  0x13   :  { %v135_v30 = vand.u32 4294901760, %v675_v20  ;;  %204 = vmatpush.msra.mxu3 %v646_v4  ;;  %v118_v32 = vsub.f32 %v659_v14, %v117_v23  ;;  %v141_v36 = vand.u32 4294901760, %v681_v25  ;;  %v708_v37 = vand.u32 4294901760, %v52_v27 }
  0x14   :  { %v124_v33 = vsub.f32 %v662_v15, %v123_v24  ;;  %170 = vmatpush.msra.mxu2 %v659_v14  ;;  %82 = vmatpush.msra.mxu0 %v648_v5  ;;  %v112_v35 = vsub.f32 %v668_v18, %v111_v28  ;;  %v712_v39 = vsub.f32 %v66_v21, %v691_v31  ;;  %v147_v40 = vand.u32 4294901760, %v684_v26 }
  0x15   :  { %206 = vmatpush.msra.mxu3 %v648_v5  ;;  %vm57_vm1 = vcmask 400384   ;;  %v119_v44 = vand.u32 4294901760, %v118_v32  ;;  %v130_v45 = vsub.f32 %v672_v19, %v129_v29  ;;  %v136_v46 = vsub.f32 %v675_v20, %v135_v30 }
  0x16   :  { %v113_v43 = vand.u32 4294901760, %v112_v35  ;;  %173 = vmatpush.msra.mxu2 %v662_v15  ;;  %84 = vmatpush.msra.mxu0 %v652_v10  ;;  %v125_v47 = vand.u32 4294901760, %v124_v33  ;;  %v335_v48 = vand.u32 4294901760, %v712_v39  ;;  %v726_v49 = vsub.f32 %v54_v22, %v700_v34 }
  0x17   :  { %208 = vmatpush.msra.mxu3 %v652_v10  ;;  %v728_v50 = vand.u32 4294901760, %v50_v38  ;;  %v142_v52 = vsub.f32 %v681_v25, %v141_v36  ;;  %v735_v53 = vsub.f32 %v52_v27, %v708_v37  ;;  %v59_v54 = vsel %vm57_vm1, %v42_v41, 0 }
  0x18   :  { %114 = vmatpush.msra.mxu1 %v113_v43  ;;  %176 = vmatpush.msra.mxu2 %v672_v19  ;;  %v738_v55 = vand.u32 4294901760, %v48_v42  ;;  %v336_v56 = vsub.f32 %v712_v39, %v335_v48  ;;  %v341_v57 = vand.u32 4294901760, %v726_v49  ;;  %v746_v58 = vand.u32 4294901760, %v59_v54 }
  0x19   :  { %86 = vmatpush.msra.mxu0 %v654_v11  ;;  %210 = vmatpush.msra.mxu3 %v654_v11  ;;  %v749_v59 = vsub.f32 %v50_v38, %v728_v50  ;;  %v131_v61 = vand.u32 4294901760, %v130_v45  ;;  %v137_v62 = vand.u32 4294901760, %v136_v46  ;;  %v347_v63 = vand.u32 4294901760, %v735_v53 }
  0x1a   :  { %120 = vmatpush.msra.mxu1 %v119_v44  ;;  %179 = vmatpush.msra.mxu2 %v675_v20  ;;  %v753_v0 = vand.u32 4294901760, %v46_v51  ;;  %v148_v1 = vsub.f32 %v684_v26, %v147_v40  ;;  %v342_v2 = vsub.f32 %v726_v49, %v341_v57  ;;  %v764_v3 = vsub.f32 %v59_v54, %v746_v58 }
  0x1b   :  { %88 = vmatpush.msra.mxu0 %v656_v12  ;;  %212 = vmatpush.msra.mxu3 %v656_v12  ;;  %v353_v6 = vand.u32 4294901760, %v749_v59  ;;  %v337_v7 = vand.u32 4294901760, %v336_v56  ;;  %v348_v8 = vsub.f32 %v735_v53, %v347_v63  ;;  %v772_v13 = vsub.f32 %v48_v42, %v738_v55 }
  0x1c   :  { %126 = vmatpush.msra.mxu1 %v125_v47  ;;  %182 = vmatpush.msra.mxu2 %v681_v25  ;;  %v774_v17 = vand.u32 4294901760, %v44_v60  ;;  %v779_v21 = vand.u32 4294901760, %v764_v3  ;;  %v143_v22 = vand.u32 4294901760, %v142_v52  ;;  %v343_v27 = vand.u32 4294901760, %v342_v2 }
  0x1d   :  { %90 = vmatpush.msra.mxu0 %v664_v16  ;;  %214 = vmatpush.msra.mxu3 %v664_v16  ;;  %v354_v32 = vsub.f32 %v749_v59, %v353_v6  ;;  %v786_v33 = vsub.f32 %v46_v51, %v753_v0  ;;  %v149_v35 = vand.u32 4294901760, %v148_v1  ;;  %v349_v38 = vand.u32 4294901760, %v348_v8 }
  0x1e   :  { %132 = vmatpush.msra.mxu1 %v131_v61  ;;  %185 = vmatpush.msra.mxu2 %v684_v26  ;;  %v359_v41 = vand.u32 4294901760, %v772_v13  ;;  %v793_v42 = vsub.f32 %v44_v60, %v774_v17  ;;  %v94_v18 = vsub.f32 %v764_v3, %v779_v21 }
  0x1f   :  { %234 = vmatpush.msrb.mxu0 %v111_v28  ;;  %338 = vmatpush.msrb.mxu3 %v337_v7  ;;  %v355_v28 = vand.u32 4294901760, %v354_v32  ;;  %v365_v43 = vand.u32 4294901760, %v786_v33 }
  0x20   :  { %302 = vmatpush.msrb.mxu2 %v691_v31  ;;  %138 = vmatpush.msra.mxu1 %v137_v62  ;;  %v360_v14 = vsub.f32 %v772_v13, %v359_v41  ;;  %v95_v44 = vand.u32 4294901760, %v94_v18 }
  0x21   :  { %238 = vmatpush.msrb.mxu0 %v117_v23  ;;  %344 = vmatpush.msrb.mxu3 %v343_v27  ;;  %v371_v23 = vand.u32 4294901760, %v793_v42  ;;  %v366_v15 = vsub.f32 %v786_v33, %v365_v43 }
  0x22   :  { %304 = vmatpush.msrb.mxu2 %v700_v34  ;;  %144 = vmatpush.msra.mxu1 %v143_v22 }
  0x23   :  { %242 = vmatpush.msrb.mxu0 %v123_v24  ;;  %350 = vmatpush.msrb.mxu3 %v349_v38  ;;  %v361_v24 = vand.u32 4294901760, %v360_v14  ;;  %v367_v19 = vand.u32 4294901760, %v366_v15 }
  0x24   :  { %306 = vmatpush.msrb.mxu2 %v708_v37  ;;  %150 = vmatpush.msra.mxu1 %v149_v35 }
  0x25   :  { %246 = vmatpush.msrb.mxu0 %v129_v29  ;;  %356 = vmatpush.msrb.mxu3 %v355_v28 }
  0x26   :  { %274 = vmatpush.msrb.mxu1 %v650_v9  ;;  %308 = vmatpush.msrb.mxu2 %v728_v50  ;;  %v372_v9 = vsub.f32 %v793_v42, %v371_v23 }
  0x27   :  { %188 = vmatmul.f32.vlgmr.msra.gmra.mxu2 %v764_v3  ;;  %250 = vmatpush.msrb.mxu0 %v135_v30 }
  0x28   :  { %276 = vmatpush.msrb.mxu1 %v646_v4  ;;  %310 = vmatpush.msrb.mxu2 %v738_v55  ;;  %v373_v4 = vand.u32 4294901760, %v372_v9 }
  0x29   :  { %96 = vmatmul.f32.vlgmr.msra.gmra.mxu0 %v95_v44  ;;  %218 = vmatmul.f32.vlgmr.msra.gmra.mxu3 %v779_v21 }
  0x2a   :  { %278 = vmatpush.msrb.mxu1 %v648_v5  ;;  %254 = vmatpush.msrb.mxu0 %v141_v36 }
  0x2b   :  { %312 = vmatpush.msrb.mxu2 %v753_v0  ;;  %362 = vmatpush.msrb.mxu3 %v361_v24 }
  0x2c   :  { %280 = vmatpush.msrb.mxu1 %v652_v10  ;;  %258 = vmatpush.msrb.mxu0 %v147_v40 }
  0x2d   :  { %152 = vmatmul.f32.vlgmr.msra.gmra.mxu1 %v746_v58  ;;  %314 = vmatpush.msrb.mxu2 %v774_v17 }
  0x2e   :  { %282 = vmatpush.msrb.mxu1 %v654_v11  ;;  %368 = vmatpush.msrb.mxu3 %v367_v19 }
  0x2f   :  { %391 = vmatpush.msra.mxu0 %v712_v39  ;;  %458 = vmatpush.msra.mxu2 %v335_v48 }
  0x30   :  { %284 = vmatpush.msrb.mxu1 %v656_v12  ;;  %374 = vmatpush.msrb.mxu3 %v373_v4 }
  0x31   :  { %394 = vmatpush.msra.mxu0 %v726_v49  ;;  %462 = vmatpush.msra.mxu2 %v341_v57 }
  0x32   :  { %498 = vmatpush.msra.mxu3 %v691_v31  ;;  %286 = vmatpush.msrb.mxu1 %v664_v16 }
  0x33   :  { %397 = vmatpush.msra.mxu0 %v735_v53  ;;  %466 = vmatpush.msra.mxu2 %v347_v63 }
  0x34   :  { %426 = vmatpush.msra.mxu1 %v691_v31  ;;  %500 = vmatpush.msra.mxu3 %v700_v34 }
  0x35   :  { %260 = vmatmul.f32.vlgmr.msrb.gmra.mxu0 %v746_v58  ;;  %320 = vmatmul.f32.vlgmr.msrb.gmra.mxu2 %v95_v44 }
  0x36   :  { %376 = vmatmul.f32.vlgmr.msrb.gmra.mxu3 %v746_v58  ;;  %400 = vmatpush.msra.mxu0 %v749_v59 }
  0x37   :  { %428 = vmatpush.msra.mxu1 %v700_v34  ;;  %470 = vmatpush.msra.mxu2 %v353_v6 }
  0x38   :  { %502 = vmatpush.msra.mxu3 %v708_v37  ;;  %288 = vmatmul.f32.vlgmr.msrb.gmra.mxu1 %v746_v58 }
  0x39   :  { %403 = vmatpush.msra.mxu0 %v772_v13  ;;  %430 = vmatpush.msra.mxu1 %v708_v37 }
  0x3a   :  { %474 = vmatpush.msra.mxu2 %v359_v41  ;;  %504 = vmatpush.msra.mxu3 %v728_v50 }
  0x3b   :  { %406 = vmatpush.msra.mxu0 %v786_v33  ;;  %432 = vmatpush.msra.mxu1 %v728_v50 }
  0x3c   :  { %478 = vmatpush.msra.mxu2 %v365_v43  ;;  %506 = vmatpush.msra.mxu3 %v738_v55 }
  0x3d   :  { %409 = vmatpush.msra.mxu0 %v793_v42  ;;  %434 = vmatpush.msra.mxu1 %v738_v55 }
  0x3e   :  { %482 = vmatpush.msra.mxu2 %v371_v23  ;;  %508 = vmatpush.msra.mxu3 %v753_v0 }
  0x3f   :  { %412 = vmatmul.f32.vlgmr.msra.gmra.mxu0 %v764_v3  ;;  %484 = vmatmul.f32.vlgmr.msra.gmra.mxu2 %v746_v58 }
  0x40   :  { %436 = vmatpush.msra.mxu1 %v753_v0  ;;  %510 = vmatpush.msra.mxu3 %v774_v17 }
  0x41   :  { %512 = vmatmul.f32.vlgmr.msra.gmra.mxu3 %v746_v58 }
  0x42   :  { %438 = vmatpush.msra.mxu1 %v774_v17 }
  0x43   :  { %442 = vmatmul.f32.vlgmr.msra.gmra.mxu1 %v779_v21 }
  0xa6   :  { %v97_v5 = vpop.f32.mrf.mxu0 }
  0xaa   :  { %v153_v10 = vpop.f32.mrf.mxu1  ;;  %v189_v12 = vpop.f32.mrf.mxu2 }
  0xab   :  { %v154_v11 = vadd.f32 %v153_v10, %v97_v5 }
  0xac   :  { %v219_v20 = vpop.f32.mrf.mxu3 }
  0xad   :  { %v190_v16 = vadd.f32 %v189_v12, %v154_v11 }
  0xaf   :  { %v220_v25 = vadd.f32 %v219_v20, %v190_v16 }
  0xb2   :  { %v261_v26 = vpop.f32.mrf.mxu0 }
  0xb3   :  { %v262_v29 = vadd.f32 %v261_v26, %v220_v25 }
  0xb5   :  { %v289_v30 = vpop.f32.mrf.mxu1 }
  0xb6   :  { %v290_v31 = vadd.f32 %v289_v30, %v262_v29 }
  0xb8   :  { %516 = vst [vmem:[#allocation7] sm:$0xff] %v290_v31  ;;  %v321_v34 = vpop.f32.mrf.mxu2 }
  0xb9   :  { %v377_v36 = vpop.f32.mrf.mxu3 }
  0xba   :  { %v378_v37 = vadd.f32 %v377_v36, %v321_v34 }
  0xbc   :  { %v413_v39 = vpop.f32.mrf.mxu0 }
  0xbd   :  { %v414_v40 = vadd.f32 %v413_v39, %v378_v37 }
  0xc0   :  { %v443_v45 = vpop.f32.mrf.mxu1 }
  0xc1   :  { %v444_v46 = vadd.f32 %v443_v45, %v414_v40 }
  0xc2   :  { %v485_v47 = vpop.f32.mrf.mxu2 }
  0xc3   :  { %v486_v48 = vadd.f32 %v485_v47, %v444_v46 }
  0xc4   :  { %v513_v49 = vpop.f32.mrf.mxu3 }
  0xc5   :  { %v514_v50 = vadd.f32 %v513_v49, %v486_v48 }
  0xc7   :  { %517 = vst [vmem:[#allocation7 + $0x8] sm:$0xff] %v514_v50 }
  0xc8   :  { %528 = dma.vmem_to_hbm [thread:$0]  %s524_s1, 256, %s526_s23, [#allocation4]  }
  0xc9   :  { %617 = dma.done.wait [#allocation4], 256  }
  0xca   :  { %618 = vsyncadd [#allocation4], 4294967040 }
  0xcb   :  { %533 = vsyncpa [#allocation3], 1 }
  0xcc   :  { %534 = vsyncpa [#allocation6], 1 }
  0xcd   :  { %535 = vsyncpa [#allocation4], 1 }

</bundles_post_ra>
